<compile_context>
chip_gen: v6e
topology: v6e:2x2x1
jax: 0.10.0
libtpu: 0.0.40
codegen_flags: <defaults>
</compile_context>

<pallas_src>
import jax
import jax.numpy as jnp
from jax.experimental import pallas as pl
from jax.experimental.pallas import tpu as pltpu

LANE = 128
RESIDENT_LIMIT_BYTES = 8 * 1024 * 1024   # keep a VMEM-resident B operand <= 8 MiB


def _round_up(v, m):
    return ((v + m - 1) // m) * m


def _choose_tiles(n):
    """Return (tm, tk, n_pad): row tile, reduction tile, padded node count.

    Every tile is a multiple of (8, 128); n_pad is divisible by both tm and
    tk; tm is kept small enough that the parallel row axis has >=2 tiles
    whenever the graph allows it (so v7x's two TensorCores both get work).
    """
    n128 = _round_up(n, LANE)
    if n128 <= LANE:                       # tiny graph: single 128x128 tile
        return LANE, LANE, LANE
    if n128 <= 1024:                       # small graph: one k tile, 2 row tiles
        return n128 // 2, n128, n128
    # large graph: fixed 512-wide reduction tiles, 512/1024 row tiles
    n_pad = _round_up(n, 512)
    tk = 512
    tm = 1024 if (n_pad % 1024 == 0 and n_pad >= 2048) else 512
    return tm, tk, n_pad


def _make_layer1_kernel(tk, x_resident):
    """s2[i] = relu((adj @ x_aug)[i] @ W1_aug) @ W2 + b2   (k = reduction axis)."""

    def kernel(adj_ref, x_ref, w1_ref, w2_ref, b2_ref, s2_ref, acc_ref):
        k = pl.program_id(1)

        @pl.when(k == 0)
        def _():
            acc_ref[...] = jnp.zeros_like(acc_ref)

        # adj is streamed f32 from HBM; downcast after the DMA (hidden under it).
        adj_bf = adj_ref[...].astype(jnp.bfloat16)
        if x_resident:
            start = pl.multiple_of(k * tk, LANE)
            x_blk = x_ref[pl.ds(start, tk), :]
        else:
            x_blk = x_ref[...]
        # N^2-heavy propagation matmul: bf16 operands, f32 accumulation.
        acc_ref[...] += jnp.dot(adj_bf, x_blk, preferred_element_type=jnp.float32)

        @pl.when(k == pl.num_programs(1) - 1)
        def _():
            ax = acc_ref[...].astype(jnp.bfloat16)      # (adj @ x_aug) row tile
            h = jnp.maximum(
                jnp.dot(ax, w1_ref[...], preferred_element_type=jnp.float32), 0.0)
            s2 = jnp.dot(h.astype(jnp.bfloat16), w2_ref[...],
                         preferred_element_type=jnp.float32) + b2_ref[...]
            s2_ref[...] = s2.astype(s2_ref.dtype)

    return kernel


def _make_propagate_kernel(tk, s_resident):
    """out[i] = sum_k adj[i, k] @ s2[k]  — accumulates directly into o_ref (f32)."""

    def kernel(adj_ref, s_ref, o_ref):
        k = pl.program_id(1)

        @pl.when(k == 0)
        def _():
            o_ref[...] = jnp.zeros_like(o_ref)

        adj_bf = adj_ref[...].astype(jnp.bfloat16)
        if s_resident:
            start = pl.multiple_of(k * tk, LANE)
            s_blk = s_ref[pl.ds(start, tk), :]
        else:
            s_blk = s_ref[...]
        o_ref[...] += jnp.dot(adj_bf, s_blk, preferred_element_type=jnp.float32)

    return kernel


def gcn_layers(x, adj, w1, b1, w2, b2):
    """out = adj @ (relu(adj @ (x @ W1 + b1)) @ W2 + b2), tiled + bf16 + lane/row padded."""
    n, c_in = x.shape
    c_hid = w1.shape[1]
    c_out = w2.shape[1]

    tm, tk, n_pad = _choose_tiles(n)

    cinp = _round_up(c_in + 1, LANE)     # +1: ones column folds b1 into W1
    hp = _round_up(c_hid, LANE)
    coutp = _round_up(c_out, LANE)

    # x_aug = [x | 1], W1_aug = [[W1],[b1]]  =>  (adj@x_aug)@W1_aug == adj@(x@W1+b1)
    x_aug = jnp.concatenate([x, jnp.ones((n, 1), x.dtype)], axis=1)
    x_pad = jnp.pad(
        x_aug, ((0, n_pad - n), (0, cinp - (c_in + 1)))).astype(jnp.bfloat16)

    w1_aug = jnp.concatenate([w1, b1.reshape(1, c_hid)], axis=0)
    w1_pad = jnp.pad(
        w1_aug, ((0, cinp - (c_in + 1)), (0, hp - c_hid))).astype(jnp.bfloat16)
    w2_pad = jnp.pad(w2, ((0, hp - c_hid), (0, coutp - c_out))).astype(jnp.bfloat16)
    b2_pad = jnp.pad(
        b2.reshape(1, c_out), ((0, 0), (0, coutp - c_out))).astype(jnp.float32)

    # Stream f32 adj (no wrapper-side bf16 cast pass); zero row/col padding is
    # an exact no-op for this computation.
    adj_in = adj.astype(jnp.float32)
    if n_pad != n:
        adj_in = jnp.pad(adj_in, ((0, n_pad - n), (0, n_pad - n)))

    grid = (n_pad // tm, n_pad // tk)
    cparams = pltpu.CompilerParams(
        dimension_semantics=("parallel", "arbitrary"),
        vmem_limit_bytes=48 * 1024 * 1024,
    )

    # ---- kernel 1: s2 = relu(adj @ (x @ W1 + b1)) @ W2 + b2 -------------------
    x_resident = n_pad * cinp * 2 <= RESIDENT_LIMIT_BYTES
    if x_resident:   # DMA x_aug once, keep it resident across all grid steps
        x_spec = pl.BlockSpec((n_pad, cinp), lambda i, k: (0, 0))
    else:            # stream the k-th (tk, cinp) slab per step
        x_spec = pl.BlockSpec((tk, cinp), lambda i, k: (k, 0))

    s2 = pl.pallas_call(
        _make_layer1_kernel(tk, x_resident),
        out_shape=jax.ShapeDtypeStruct((n_pad, coutp), jnp.bfloat16),
        grid_spec=pltpu.PrefetchScalarGridSpec(
            num_scalar_prefetch=0,
            grid=grid,
            in_specs=[
                pl.BlockSpec((tm, tk), lambda i, k: (i, k)),      # adj (f32 stream)
                x_spec,                                           # x_aug (padded)
                pl.BlockSpec((cinp, hp), lambda i, k: (0, 0)),    # W1_aug (padded)
                pl.BlockSpec((hp, coutp), lambda i, k: (0, 0)),   # W2 (padded)
                pl.BlockSpec((1, coutp), lambda i, k: (0, 0)),    # b2 (padded)
            ],
            out_specs=pl.BlockSpec((tm, coutp), lambda i, k: (i, 0)),
            scratch_shapes=[pltpu.VMEM((tm, cinp), jnp.float32)],
        ),
        compiler_params=cparams,
    )(adj_in, x_pad, w1_pad, w2_pad, b2_pad)

    # ---- kernel 2: out = adj @ s2 --------------------------------------------
    s_resident = n_pad * coutp * 2 <= RESIDENT_LIMIT_BYTES
    if s_resident:
        s_spec = pl.BlockSpec((n_pad, coutp), lambda i, k: (0, 0))
    else:
        s_spec = pl.BlockSpec((tk, coutp), lambda i, k: (k, 0))

    out_pad = pl.pallas_call(
        _make_propagate_kernel(tk, s_resident),
        out_shape=jax.ShapeDtypeStruct((n_pad, coutp), jnp.float32),
        grid_spec=pltpu.PrefetchScalarGridSpec(
            num_scalar_prefetch=0,
            grid=grid,
            in_specs=[
                pl.BlockSpec((tm, tk), lambda i, k: (i, k)),      # adj (f32 stream)
                s_spec,                                           # s2
            ],
            out_specs=pl.BlockSpec((tm, coutp), lambda i, k: (i, 0)),
        ),
        compiler_params=cparams,
    )(adj_in, s2)

    return out_pad[:n, :c_out]


def init_linear_params(key, fan_in, fan_out):
    """Deterministic init mimicking torch.nn.Linear default (kaiming-uniform-ish)."""
    kw, kb = jax.random.split(key)
    bound = 1.0 / jnp.sqrt(fan_in)
    w = jax.random.uniform(kw, (fan_in, fan_out), jnp.float32, -bound, bound)
    b = jax.random.uniform(kb, (1, fan_out), jnp.float32, -bound, bound)
    return w, b


def _make_inputs(key, n, c_in, c_hid, c_out):
    k_x, k_adj, k_l1, k_l2 = jax.random.split(key, 4)
    x = jax.random.normal(k_x, (n, c_in), jnp.float32)
    # Symmetric, row-normalized adjacency with self-loops (typical GCN input).
    a = (jax.random.uniform(k_adj, (n, n)) < 0.3).astype(jnp.float32)
    a = jnp.maximum(a, a.T) + jnp.eye(n, dtype=jnp.float32)
    adj = a / jnp.sum(a, axis=1, keepdims=True)
    w1, b1 = init_linear_params(k_l1, c_in, c_hid)
    w2, b2 = init_linear_params(k_l2, c_hid, c_out)
    return x, adj, w1, b1, w2, b2


def _reference(x, adj, w1, b1, w2, b2):
    h = jnp.maximum(adj @ (x @ w1 + b1), 0.0)
    return adj @ (h @ w2 + b2)


if __name__ == "__main__":
    C_IN, C_HID, C_OUT = 16, 32, 8
    fwd = jax.jit(gcn_layers)

    key = jax.random.PRNGKey(0)
    # Two sizes: the toy module-scale graph, and a non-multiple-of-128 N that
    # exercises the zero-padding / multi-row-tile path.
    for n in (8, 200):
        x, adj, w1, b1, w2, b2 = _make_inputs(key, n, C_IN, C_HID, C_OUT)
        out = fwd(x, adj, w1, b1, w2, b2)
        jax.block_until_ready(out)

        out_ref = _reference(x, adj, w1, b1, w2, b2)
        assert out.shape == (n, C_OUT)
        assert jnp.allclose(out, out_ref, atol=5e-2, rtol=5e-2), (
            n, float(jnp.max(jnp.abs(out - out_ref))))

    print("KERNEL_OK")
</pallas_src>

<mosaic_0001>
module attributes {stable_mosaic.version = 11 : i64} {
  func.func @kernel(%arg0: i32, %arg1: i32, %arg2: memref<128x128xf32, #tpu.memory_space<vmem>>, %arg3: memref<128x128xbf16, #tpu.memory_space<vmem>>, %arg4: memref<128x128xf32, #tpu.memory_space<vmem>>) attributes {dimension_semantics = [#tpu.dimension_semantics<parallel>, #tpu.dimension_semantics<arbitrary>], iteration_bounds = array<i64: 1, 1>, scalar_prefetch = 0 : i64, scratch_operands = 0 : i64, tpu.core_type = #tpu.core_type<tc>, window_params = [{transform_indices = @transform_0, window_bounds = array<i64: 128, 128>}, {pipeline_mode = #tpu.pipeline_mode<synchronous>, transform_indices = @transform_1, window_bounds = array<i64: 128, 128>}, {transform_indices = @transform_2, window_bounds = array<i64: 128, 128>}]} {
    %c0_i32 = arith.constant 0 : i32
    %0 = arith.cmpi eq, %arg1, %c0_i32 : i32
    %1 = arith.extui %0 : i1 to i32
    %c0_i32_0 = arith.constant 0 : i32
    %2 = arith.cmpi ne, %1, %c0_i32_0 : i32
    scf.if %2 {
      %cst_7 = arith.constant 0.000000e+00 : f32
      %13 = vector.broadcast %cst_7 : f32 to vector<128x128xf32>
      %c0_8 = arith.constant 0 : index
      %c0_9 = arith.constant 0 : index
      %14 = vector.load %arg4[%c0_8, %c0_9] : memref<128x128xf32, #tpu.memory_space<vmem>>, vector<128x128xf32>
      tpu.vector_store %arg4[%c0_8, %c0_9], %13 {strides = array<i32>} : memref<128x128xf32, #tpu.memory_space<vmem>>, vector<128x128xf32>,
    } else {
    }
    %c0 = arith.constant 0 : index
    %c0_1 = arith.constant 0 : index
    %3 = vector.load %arg2[%c0, %c0_1] : memref<128x128xf32, #tpu.memory_space<vmem>>, vector<128x128xf32>
    %4 = arith.truncf %3 : vector<128x128xf32> to vector<128x128xbf16>
    %c128_i32 = arith.constant 128 : i32
    %5 = arith.muli %arg1, %c128_i32 : i32
    %6 = tpu.assume_multiple %5, 128 : i32
    %7 = arith.index_cast %6 : i32 to index
    %c0_2 = arith.constant 0 : index
    %8 = vector.load %arg3[%7, %c0_2] : memref<128x128xbf16, #tpu.memory_space<vmem>>, vector<128x128xbf16>
    %c0_3 = arith.constant 0 : index
    %c0_4 = arith.constant 0 : index
    %9 = vector.load %arg4[%c0_3, %c0_4] : memref<128x128xf32, #tpu.memory_space<vmem>>, vector<128x128xf32>
    %cst = arith.constant dense<0.000000e+00> : vector<128x128xf32>
    %10 = tpu.matmul %4, %8, %cst {dimension_numbers = #tpu.dot_dimension_numbers<[1], [0], [0], [1], [0, 0, 1, 1], [], []>} : vector<128x128xbf16>, vector<128x128xbf16>, vector<128x128xf32> -> vector<128x128xf32>
    %11 = arith.addf %9, %10 : vector<128x128xf32>
    %c0_5 = arith.constant 0 : index
    %c0_6 = arith.constant 0 : index
    %12 = vector.load %arg4[%c0_5, %c0_6] : memref<128x128xf32, #tpu.memory_space<vmem>>, vector<128x128xf32>
    tpu.vector_store %arg4[%c0_5, %c0_6], %11 {strides = array<i32>} : memref<128x128xf32, #tpu.memory_space<vmem>>, vector<128x128xf32>,
    return
  }
  func.func @transform_0(%arg0: i32, %arg1: i32) -> (i32, i32) {
    %c0_i32 = arith.constant 0 : i32
    return %arg0, %arg1 : i32, i32
  }
  func.func @transform_1(%arg0: i32, %arg1: i32) -> (i32, i32) {
    %c0_i32 = arith.constant 0 : i32
    %c0_i32_0 = arith.constant 0 : i32
    %c0_i32_1 = arith.constant 0 : i32
    return %c0_i32, %c0_i32_0 : i32, i32
  }
  func.func @transform_2(%arg0: i32, %arg1: i32) -> (i32, i32) {
    %c0_i32 = arith.constant 0 : i32
    %c0_i32_0 = arith.constant 0 : i32
    return %arg0, %c0_i32 : i32, i32
  }
}

module attributes {stable_mosaic.version = 11 : i64} {
  func.func @kernel(%arg0: i32, %arg1: i32, %arg2: memref<128x128xf32, #tpu.memory_space<vmem>>, %arg3: memref<128x128xbf16, #tpu.memory_space<vmem>>, %arg4: memref<128x128xbf16, #tpu.memory_space<vmem>>, %arg5: memref<128x128xbf16, #tpu.memory_space<vmem>>, %arg6: memref<1x128xf32, #tpu.memory_space<vmem>>, %arg7: memref<128x128xbf16, #tpu.memory_space<vmem>>, %arg8: memref<128x128xf32, #tpu.memory_space<vmem>>) attributes {dimension_semantics = [#tpu.dimension_semantics<parallel>, #tpu.dimension_semantics<arbitrary>], iteration_bounds = array<i64: 1, 1>, scalar_prefetch = 0 : i64, scratch_operands = 1 : i64, tpu.core_type = #tpu.core_type<tc>, window_params = [{transform_indices = @transform_0, window_bounds = array<i64: 128, 128>}, {pipeline_mode = #tpu.pipeline_mode<synchronous>, transform_indices = @transform_1, window_bounds = array<i64: 128, 128>}, {pipeline_mode = #tpu.pipeline_mode<synchronous>, transform_indices = @transform_2, window_bounds = array<i64: 128, 128>}, {pipeline_mode = #tpu.pipeline_mode<synchronous>, transform_indices = @transform_3, window_bounds = array<i64: 128, 128>}, {pipeline_mode = #tpu.pipeline_mode<synchronous>, transform_indices = @transform_4, window_bounds = array<i64: 1, 128>}, {transform_indices = @transform_5, window_bounds = array<i64: 128, 128>}]} {
    %c0_i32 = arith.constant 0 : i32
    %0 = arith.cmpi eq, %arg1, %c0_i32 : i32
    %1 = arith.extui %0 : i1 to i32
    %c0_i32_0 = arith.constant 0 : i32
    %2 = arith.cmpi ne, %1, %c0_i32_0 : i32
    scf.if %2 {
      %cst_9 = arith.constant 0.000000e+00 : f32
      %16 = vector.broadcast %cst_9 : f32 to vector<128x128xf32>
      %c0_10 = arith.constant 0 : index
      %c0_11 = arith.constant 0 : index
      %17 = vector.load %arg8[%c0_10, %c0_11] : memref<128x128xf32, #tpu.memory_space<vmem>>, vector<128x128xf32>
      tpu.vector_store %arg8[%c0_10, %c0_11], %16 {strides = array<i32>} : memref<128x128xf32, #tpu.memory_space<vmem>>, vector<128x128xf32>,
    } else {
    }
    %c0 = arith.constant 0 : index
    %c0_1 = arith.constant 0 : index
    %3 = vector.load %arg2[%c0, %c0_1] : memref<128x128xf32, #tpu.memory_space<vmem>>, vector<128x128xf32>
    %4 = arith.truncf %3 : vector<128x128xf32> to vector<128x128xbf16>
    %c128_i32 = arith.constant 128 : i32
    %5 = arith.muli %arg1, %c128_i32 : i32
    %6 = tpu.assume_multiple %5, 128 : i32
    %7 = arith.index_cast %6 : i32 to index
    %c0_2 = arith.constant 0 : index
    %8 = vector.load %arg3[%7, %c0_2] : memref<128x128xbf16, #tpu.memory_space<vmem>>, vector<128x128xbf16>
    %c0_3 = arith.constant 0 : index
    %c0_4 = arith.constant 0 : index
    %9 = vector.load %arg8[%c0_3, %c0_4] : memref<128x128xf32, #tpu.memory_space<vmem>>, vector<128x128xf32>
    %cst = arith.constant dense<0.000000e+00> : vector<128x128xf32>
    %10 = tpu.matmul %4, %8, %cst {dimension_numbers = #tpu.dot_dimension_numbers<[1], [0], [0], [1], [0, 0, 1, 1], [], []>} : vector<128x128xbf16>, vector<128x128xbf16>, vector<128x128xf32> -> vector<128x128xf32>
    %11 = arith.addf %9, %10 : vector<128x128xf32>
    %c0_5 = arith.constant 0 : index
    %c0_6 = arith.constant 0 : index
    %12 = vector.load %arg8[%c0_5, %c0_6] : memref<128x128xf32, #tpu.memory_space<vmem>>, vector<128x128xf32>
    tpu.vector_store %arg8[%c0_5, %c0_6], %11 {strides = array<i32>} : memref<128x128xf32, #tpu.memory_space<vmem>>, vector<128x128xf32>,
    %c0_i32_7 = arith.constant 0 : i32
    %13 = arith.cmpi eq, %arg1, %c0_i32_7 : i32
    %14 = arith.extui %13 : i1 to i32
    %c0_i32_8 = arith.constant 0 : i32
    %15 = arith.cmpi ne, %14, %c0_i32_8 : i32
    scf.if %15 {
      %c0_9 = arith.constant 0 : index
      %c0_10 = arith.constant 0 : index
      %16 = vector.load %arg8[%c0_9, %c0_10] : memref<128x128xf32, #tpu.memory_space<vmem>>, vector<128x128xf32>
      %17 = arith.truncf %16 : vector<128x128xf32> to vector<128x128xbf16>
      %c0_11 = arith.constant 0 : index
      %c0_12 = arith.constant 0 : index
      %18 = vector.load %arg4[%c0_11, %c0_12] : memref<128x128xbf16, #tpu.memory_space<vmem>>, vector<128x128xbf16>
      %cst_13 = arith.constant dense<0.000000e+00> : vector<128x128xf32>
      %19 = tpu.matmul %17, %18, %cst_13 {dimension_numbers = #tpu.dot_dimension_numbers<[1], [0], [0], [1], [0, 0, 1, 1], [], []>} : vector<128x128xbf16>, vector<128x128xbf16>, vector<128x128xf32> -> vector<128x128xf32>
      %cst_14 = arith.constant 0.000000e+00 : f32
      %20 = vector.broadcast %cst_14 : f32 to vector<128x128xf32>
      %21 = arith.maximumf %19, %20 : vector<128x128xf32>
      %22 = arith.truncf %21 : vector<128x128xf32> to vector<128x128xbf16>
      %c0_15 = arith.constant 0 : index
      %c0_16 = arith.constant 0 : index
      %23 = vector.load %arg5[%c0_15, %c0_16] : memref<128x128xbf16, #tpu.memory_space<vmem>>, vector<128x128xbf16>
      %cst_17 = arith.constant dense<0.000000e+00> : vector<128x128xf32>
      %24 = tpu.matmul %22, %23, %cst_17 {dimension_numbers = #tpu.dot_dimension_numbers<[1], [0], [0], [1], [0, 0, 1, 1], [], []>} : vector<128x128xbf16>, vector<128x128xbf16>, vector<128x128xf32> -> vector<128x128xf32>
      %c0_18 = arith.constant 0 : index
      %c0_19 = arith.constant 0 : index
      %25 = vector.load %arg6[%c0_18, %c0_19] : memref<1x128xf32, #tpu.memory_space<vmem>>, vector<1x128xf32>
      %26 = vector.broadcast %25 : vector<1x128xf32> to vector<128x128xf32>
      %27 = arith.addf %24, %26 : vector<128x128xf32>
      %28 = arith.truncf %27 : vector<128x128xf32> to vector<128x128xbf16>
      %c0_20 = arith.constant 0 : index
      %c0_21 = arith.constant 0 : index
      %29 = vector.load %arg7[%c0_20, %c0_21] : memref<128x128xbf16, #tpu.memory_space<vmem>>, vector<128x128xbf16>
      tpu.vector_store %arg7[%c0_20, %c0_21], %28 {strides = array<i32>} : memref<128x128xbf16, #tpu.memory_space<vmem>>, vector<128x128xbf16>,
    } else {
    }
    return
  }
  func.func @transform_0(%arg0: i32, %arg1: i32) -> (i32, i32) {
    %c0_i32 = arith.constant 0 : i32
    return %arg0, %arg1 : i32, i32
  }
  func.func @transform_1(%arg0: i32, %arg1: i32) -> (i32, i32) {
    %c0_i32 = arith.constant 0 : i32
    %c0_i32_0 = arith.constant 0 : i32
    %c0_i32_1 = arith.constant 0 : i32
    return %c0_i32, %c0_i32_0 : i32, i32
  }
  func.func @transform_2(%arg0: i32, %arg1: i32) -> (i32, i32) {
    %c0_i32 = arith.constant 0 : i32
    %c0_i32_0 = arith.constant 0 : i32
    %c0_i32_1 = arith.constant 0 : i32
    return %c0_i32, %c0_i32_0 : i32, i32
  }
  func.func @transform_3(%arg0: i32, %arg1: i32) -> (i32, i32) {
    %c0_i32 = arith.constant 0 : i32
    %c0_i32_0 = arith.constant 0 : i32
    %c0_i32_1 = arith.constant 0 : i32
    return %c0_i32, %c0_i32_0 : i32, i32
  }
  func.func @transform_4(%arg0: i32, %arg1: i32) -> (i32, i32) {
    %c0_i32 = arith.constant 0 : i32
    %c0_i32_0 = arith.constant 0 : i32
    %c0_i32_1 = arith.constant 0 : i32
    return %c0_i32, %c0_i32_0 : i32, i32
  }
  func.func @transform_5(%arg0: i32, %arg1: i32) -> (i32, i32) {
    %c0_i32 = arith.constant 0 : i32
    %c0_i32_0 = arith.constant 0 : i32
    return %arg0, %c0_i32 : i32, i32
  }
}

</mosaic_0001>

<bundles_post_ra>
// kernel: gcn_layers.3
= control target key start
LH: loop header
LB: loop body
LE: loop exit
PB: predicated region body
PF: predicated region fallthrough
CT: control target
= control target key end

     0   :  { %s492_s1 = inlined_call_operand.vmem [shape: bf16[128,128], index: 1, kind: input, shape index: {}]   ;;  %s493_s0 = inlined_call_operand.vmem [shape: f32[128,128], index: 0, kind: input, shape index: {}]   ;;  %s494_s2 = inlined_call_operand.vmem [shape: f32[128,128], index: 2, kind: output, shape index: {}]  }
   0x1   :  { %v349_v0 = vld [vmem:[%s492_s1 + $0x38] sm:$0xff]   ;;  %v350_v1 = vld [vmem:[%s492_s1 + $0x30] sm:$0xff]   ;;  %v351_v2 = vld [vmem:[%s492_s1 + $0x28] sm:$0xff]  }
   0x2   :  { %300 = vmatprep.subr.bf16.mxu0 %v349_v0  ;;  %332 = vmatprep.subr.bf16.mxu1 %v349_v0  ;;  %v352_v3 = vld [vmem:[%s492_s1 + $0x20] sm:$0xff]   ;;  %v33_v5 = vld [vmem:[%s493_s0 + $0x8] sm:$0xff]  ;;  %v353_v10 = vld [vmem:[%s492_s1 + $0x18] sm:$0xff]  }
   0x3   :  { %301 = vmatpush3.bf16.msra.mxu0 %v349_v0  ;;  %340 = vmatpush3.bf16.msra.mxu1 %v349_v0  ;;  %v32_v4 = vld [vmem:[%s493_s0] sm:$0xff]  ;;  %v41_v8 = vld [vmem:[%s493_s0 + $0x48] sm:$0xff]  ;;  %v354_v11 = vld [vmem:[%s492_s1 + $0x10] sm:$0xff]  }
   0x4   :  { %302 = vmatprep.subr.bf16.mxu0 %v350_v1  ;;  %333 = vmatprep.subr.bf16.mxu1 %v350_v1  ;;  %v40_v6 = vld [vmem:[%s493_s0 + $0x40] sm:$0xff]  ;;  %v48_v7 = vpack.c.bf16 %v33_v5, %v32_v4  ;;  %v355_v12 = vld [vmem:[%s492_s1 + $0x8] sm:$0xff]   ;;  %v34_v14 = vld [vmem:[%s493_s0 + $0x10] sm:$0xff] }
   0x5   :  { %v52_v9 = vpack.c.bf16 %v41_v8, %v40_v6  ;;  %v356_v13 = vld [vmem:[%s492_s1] sm:$0xff]   ;;  %v35_v15 = vld [vmem:[%s493_s0 + $0x18] sm:$0xff]  ;;  %v42_v16 = vld [vmem:[%s493_s0 + $0x50] sm:$0xff] }
   0x6   :  { %316 = vmatprep.mubr.bf16.mxu0 %v48_v7  ;;  %v43_v17 = vld [vmem:[%s493_s0 + $0x58] sm:$0xff]  ;;  %v36_v18 = vld [vmem:[%s493_s0 + $0x20] sm:$0xff]  ;;  %v37_v19 = vld [vmem:[%s493_s0 + $0x28] sm:$0xff]  ;;  %v49_v22 = vpack.c.bf16 %v35_v15, %v34_v14 }
   0x7   :  { %303 = vmatpush3.bf16.msra.mxu0 %v350_v1  ;;  %341 = vmatpush3.bf16.msra.mxu1 %v350_v1  ;;  %v44_v20 = vld [vmem:[%s493_s0 + $0x60] sm:$0xff]  ;;  %v45_v21 = vld [vmem:[%s493_s0 + $0x68] sm:$0xff]  ;;  %v53_v23 = vpack.c.bf16 %v43_v17, %v42_v16  ;;  %v50_v24 = vpack.c.bf16 %v37_v19, %v36_v18  ;;  %v38_v26 = vld [vmem:[%s493_s0 + $0x30] sm:$0xff] }
   0x8   :  { %304 = vmatprep.subr.bf16.mxu0 %v351_v2  ;;  %334 = vmatprep.subr.bf16.mxu1 %v351_v2  ;;  %v54_v25 = vpack.c.bf16 %v45_v21, %v44_v20  ;;  %v39_v27 = vld [vmem:[%s493_s0 + $0x38] sm:$0xff]  ;;  %v46_v28 = vld [vmem:[%s493_s0 + $0x70] sm:$0xff] }
   0x9   :  { %324 = vmatprep.mubr.bf16.mxu1 %v52_v9  ;;  %v47_v29 = vld [vmem:[%s493_s0 + $0x78] sm:$0xff]  ;;  %v51_v30 = vpack.c.bf16 %v39_v27, %v38_v26 }
   0xa   :  { %v55_v31 = vpack.c.bf16 %v47_v29, %v46_v28 }
   0xb   :  { %305 = vmatpush3.bf16.msra.mxu0 %v351_v2  ;;  %342 = vmatpush3.bf16.msra.mxu1 %v351_v2 }
   0xc   :  { %306 = vmatprep.subr.bf16.mxu0 %v352_v3  ;;  %335 = vmatprep.subr.bf16.mxu1 %v352_v3 }
   0xf   :  { %307 = vmatpush3.bf16.msra.mxu0 %v352_v3  ;;  %343 = vmatpush3.bf16.msra.mxu1 %v352_v3 }
  0x10   :  { %308 = vmatprep.subr.bf16.mxu0 %v353_v10  ;;  %336 = vmatprep.subr.bf16.mxu1 %v353_v10 }
  0x13   :  { %309 = vmatpush3.bf16.msra.mxu0 %v353_v10  ;;  %344 = vmatpush3.bf16.msra.mxu1 %v353_v10 }
  0x14   :  { %310 = vmatprep.subr.bf16.mxu0 %v354_v11  ;;  %337 = vmatprep.subr.bf16.mxu1 %v354_v11 }
  0x17   :  { %311 = vmatpush3.bf16.msra.mxu0 %v354_v11  ;;  %345 = vmatpush3.bf16.msra.mxu1 %v354_v11 }
  0x18   :  { %312 = vmatprep.subr.bf16.mxu0 %v355_v12  ;;  %338 = vmatprep.subr.bf16.mxu1 %v355_v12 }
  0x1b   :  { %313 = vmatpush3.bf16.msra.mxu0 %v355_v12  ;;  %346 = vmatpush3.bf16.msra.mxu1 %v355_v12 }
  0x1c   :  { %314 = vmatprep.subr.bf16.mxu0 %v356_v13  ;;  %339 = vmatprep.subr.bf16.mxu1 %v356_v13 }
  0x1f   :  { %315 = vmatpush3.bf16.msra.mxu0 %v356_v13  ;;  %347 = vmatpush3.bf16.msra.mxu1 %v356_v13 }
  0x22   :  { %317 = vmatmul.mubr.bf16.vlgmr.msra.gmra.mxu0 %v49_v22  ;;  %325 = vmatmul.mubr.bf16.vlgmr.msra.gmra.mxu1 %v53_v23 }
  0x23   :  { %320 = vmatprep.mubr.bf16.mxu0 %v50_v24  ;;  %328 = vmatprep.mubr.bf16.mxu1 %v54_v25 }
  0x2a   :  { %321 = vmatmul.mubr.bf16.gmra.mxu0 %v51_v30  ;;  %329 = vmatmul.mubr.bf16.gmra.mxu1 %v55_v31 }
  0xe2   :  { %v318_v32 = vpop.f32.mrf.mxu0  ;;  %v326_v33 = vpop.f32.mrf.mxu1 }
  0xe3   :  { %256 = vst [vmem:[%s494_s2 + $0x10] sm:$0xff] %v318_v32  ;;  %264 = vst [vmem:[%s494_s2 + $0x50] sm:$0xff] %v326_v33 }
  0xe4   :  { %v175_v34 = vpop.f32.mrf.mxu0  ;;  %v207_v35 = vpop.f32.mrf.mxu1 }
  0xe5   :  { %254 = vst [vmem:[%s494_s2] sm:$0xff] %v175_v34  ;;  %262 = vst [vmem:[%s494_s2 + $0x40] sm:$0xff] %v207_v35 }
  0xe6   :  { %v319_v36 = vpop.f32.mrf.mxu0  ;;  %v327_v37 = vpop.f32.mrf.mxu1 }
  0xe7   :  { %257 = vst [vmem:[%s494_s2 + $0x18] sm:$0xff] %v319_v36  ;;  %265 = vst [vmem:[%s494_s2 + $0x58] sm:$0xff] %v327_v37 }
  0xe8   :  { %v178_v38 = vpop.f32.mrf.mxu0  ;;  %v210_v39 = vpop.f32.mrf.mxu1 }
  0xe9   :  { %255 = vst [vmem:[%s494_s2 + $0x8] sm:$0xff] %v178_v38  ;;  %263 = vst [vmem:[%s494_s2 + $0x48] sm:$0xff] %v210_v39 }
  0xea   :  { %v322_v40 = vpop.f32.mrf.mxu0  ;;  %v330_v41 = vpop.f32.mrf.mxu1 }
  0xeb   :  { %260 = vst [vmem:[%s494_s2 + $0x30] sm:$0xff] %v322_v40  ;;  %268 = vst [vmem:[%s494_s2 + $0x70] sm:$0xff] %v330_v41 }
  0xec   :  { %v191_v42 = vpop.f32.mrf.mxu0  ;;  %v223_v43 = vpop.f32.mrf.mxu1 }
  0xed   :  { %258 = vst [vmem:[%s494_s2 + $0x20] sm:$0xff] %v191_v42  ;;  %266 = vst [vmem:[%s494_s2 + $0x60] sm:$0xff] %v223_v43 }
  0xee   :  { %v323_v44 = vpop.f32.mrf.mxu0  ;;  %v331_v45 = vpop.f32.mrf.mxu1 }
  0xef   :  { %261 = vst [vmem:[%s494_s2 + $0x38] sm:$0xff] %v323_v44  ;;  %269 = vst [vmem:[%s494_s2 + $0x78] sm:$0xff] %v331_v45 }
  0xf0   :  { %v194_v46 = vpop.f32.mrf.mxu0  ;;  %v226_v47 = vpop.f32.mrf.mxu1 }
  0xf1   :  { %259 = vst [vmem:[%s494_s2 + $0x28] sm:$0xff] %v194_v46  ;;  %267 = vst [vmem:[%s494_s2 + $0x68] sm:$0xff] %v226_v47 }

// kernel: gcn_layers.2
= control target key start
LH: loop header
LB: loop body
LE: loop exit
PB: predicated region body
PF: predicated region fallthrough
CT: control target
= control target key end

     0   :  { %s1210_s1 = inlined_call_operand.vmem [shape: bf16[128,128], index: 1, kind: input, shape index: {}]   ;;  %s1211_s0 = inlined_call_operand.vmem [shape: f32[128,128], index: 0, kind: input, shape index: {}]   ;;  %s1212_s2 = inlined_call_operand.vmem [shape: bf16[128,128], index: 2, kind: input, shape index: {}]   ;;  %s1213_s3 = inlined_call_operand.vmem [shape: bf16[128,128], index: 3, kind: input, shape index: {}]   ;;  %s1214_s4 = inlined_call_operand.vmem [shape: f32[1,128], index: 4, kind: input, shape index: {}]   ;;  %s1215_s5 = inlined_call_operand.vmem [shape: bf16[128,128], index: 5, kind: output, shape index: {}]  }
   0x1   :  { %v1009_v0 = vld [vmem:[%s1210_s1 + $0x38] sm:$0xff]   ;;  %v1010_v1 = vld [vmem:[%s1210_s1 + $0x30] sm:$0xff]   ;;  %v1011_v2 = vld [vmem:[%s1210_s1 + $0x28] sm:$0xff]  }
   0x2   :  { %897 = vmatprep.subr.bf16.mxu0 %v1009_v0  ;;  %v1012_v3 = vld [vmem:[%s1210_s1 + $0x20] sm:$0xff]   ;;  %v42_v5 = vld [vmem:[%s1211_s0 + $0x8] sm:$0xff]  ;;  %v1013_v7 = vld [vmem:[%s1210_s1 + $0x18] sm:$0xff]  }
   0x3   :  { %898 = vmatpush3.bf16.msra.mxu0 %v1009_v0  ;;  %v41_v4 = vld [vmem:[%s1211_s0] sm:$0xff]  ;;  %v1017_v8 = vld [vmem:[%s1212_s2 + $0x38] sm:$0xff]   ;;  %v1018_v9 = vld [vmem:[%s1212_s2 + $0x30] sm:$0xff]  }
   0x4   :  { %899 = vmatprep.subr.bf16.mxu0 %v1010_v1  ;;  %v57_v6 = vpack.c.bf16 %v42_v5, %v41_v4  ;;  %v1014_v10 = vld [vmem:[%s1210_s1 + $0x10] sm:$0xff]   ;;  %929 = vmatprep.subr.bf16.mxu1 %v1017_v8  ;;  %v1019_v11 = vld [vmem:[%s1212_s2 + $0x28] sm:$0xff]   ;;  %v1020_v13 = vld [vmem:[%s1212_s2 + $0x20] sm:$0xff]  }
   0x5   :  { %930 = vmatpush3.bf16.msra.mxu1 %v1017_v8  ;;  %v1015_v12 = vld [vmem:[%s1210_s1 + $0x8] sm:$0xff]   ;;  %v1016_v14 = vld [vmem:[%s1210_s1] sm:$0xff]   ;;  %v1021_v15 = vld [vmem:[%s1212_s2 + $0x18] sm:$0xff]  }
   0x6   :  { %913 = vmatprep.mubr.bf16.mxu0 %v57_v6  ;;  %931 = vmatprep.subr.bf16.mxu1 %v1018_v9  ;;  %v43_v16 = vld [vmem:[%s1211_s0 + $0x10] sm:$0xff]  ;;  %v44_v17 = vld [vmem:[%s1211_s0 + $0x18] sm:$0xff]  ;;  %v45_v18 = vld [vmem:[%s1211_s0 + $0x20] sm:$0xff] }
   0x7   :  { %900 = vmatpush3.bf16.msra.mxu0 %v1010_v1  ;;  %v46_v19 = vld [vmem:[%s1211_s0 + $0x28] sm:$0xff]  ;;  %v58_v20 = vpack.c.bf16 %v44_v17, %v43_v16  ;;  %v1022_v21 = vld [vmem:[%s1212_s2 + $0x10] sm:$0xff]   ;;  %v48_v24 = vld [vmem:[%s1211_s0 + $0x38] sm:$0xff] }
   0x8   :  { %901 = vmatprep.subr.bf16.mxu0 %v1011_v2  ;;  %v59_v22 = vpack.c.bf16 %v46_v19, %v45_v18  ;;  %v47_v23 = vld [vmem:[%s1211_s0 + $0x30] sm:$0xff]  ;;  %v49_v25 = vld [vmem:[%s1211_s0 + $0x40] sm:$0xff]  ;;  %v50_v26 = vld [vmem:[%s1211_s0 + $0x48] sm:$0xff] }
   0x9   :  { %932 = vmatpush3.bf16.msra.mxu1 %v1018_v9  ;;  %v60_v27 = vpack.c.bf16 %v48_v24, %v47_v23  ;;  %v61_v28 = vpack.c.bf16 %v50_v26, %v49_v25  ;;  %v51_v29 = vld [vmem:[%s1211_s0 + $0x50] sm:$0xff]  ;;  %v52_v30 = vld [vmem:[%s1211_s0 + $0x58] sm:$0xff]  ;;  %v53_v31 = vld [vmem:[%s1211_s0 + $0x60] sm:$0xff] }
   0xa   :  { %933 = vmatprep.subr.bf16.mxu1 %v1019_v11  ;;  %v54_v32 = vld [vmem:[%s1211_s0 + $0x68] sm:$0xff]  ;;  %v62_v33 = vpack.c.bf16 %v52_v30, %v51_v29  ;;  %v55_v35 = vld [vmem:[%s1211_s0 + $0x70] sm:$0xff]  ;;  %v56_v36 = vld [vmem:[%s1211_s0 + $0x78] sm:$0xff] }
   0xb   :  { %902 = vmatpush3.bf16.msra.mxu0 %v1011_v2  ;;  %v63_v34 = vpack.c.bf16 %v54_v32, %v53_v31  ;;  %v64_v37 = vpack.c.bf16 %v56_v36, %v55_v35  ;;  %v1023_v38 = vld [vmem:[%s1212_s2 + $0x8] sm:$0xff]   ;;  %v1024_v39 = vld [vmem:[%s1212_s2] sm:$0xff]   ;;  %v1025_v40 = vld [vmem:[%s1213_s3 + $0x38] sm:$0xff]  }
   0xc   :  { %903 = vmatprep.subr.bf16.mxu0 %v1012_v3  ;;  %v1026_v41 = vld [vmem:[%s1213_s3 + $0x30] sm:$0xff]   ;;  %v1027_v42 = vld [vmem:[%s1213_s3 + $0x28] sm:$0xff]   ;;  %v1028_v43 = vld [vmem:[%s1213_s3 + $0x20] sm:$0xff]  }
   0xd   :  { %934 = vmatpush3.bf16.msra.mxu1 %v1019_v11  ;;  %v1029_v44 = vld [vmem:[%s1213_s3 + $0x18] sm:$0xff]   ;;  %v1030_v5 = vld [vmem:[%s1213_s3 + $0x10] sm:$0xff]   ;;  %v1031_v6 = vld [vmem:[%s1213_s3 + $0x8] sm:$0xff]  }
   0xe   :  { %935 = vmatprep.subr.bf16.mxu1 %v1020_v13 }
   0xf   :  { %904 = vmatpush3.bf16.msra.mxu0 %v1012_v3 }
  0x10   :  { %905 = vmatprep.subr.bf16.mxu0 %v1013_v7 }
  0x11   :  { %936 = vmatpush3.bf16.msra.mxu1 %v1020_v13 }
  0x12   :  { %937 = vmatprep.subr.bf16.mxu1 %v1021_v15 }
  0x13   :  { %906 = vmatpush3.bf16.msra.mxu0 %v1013_v7  ;;  %v1032_v7 = vld [vmem:[%s1213_s3] sm:$0xff]  }
  0x14   :  { %907 = vmatprep.subr.bf16.mxu0 %v1014_v10 }
  0x15   :  { %938 = vmatpush3.bf16.msra.mxu1 %v1021_v15 }
  0x16   :  { %939 = vmatprep.subr.bf16.mxu1 %v1022_v21 }
  0x17   :  { %908 = vmatpush3.bf16.msra.mxu0 %v1014_v10 }
  0x18   :  { %909 = vmatprep.subr.bf16.mxu0 %v1015_v12 }
  0x19   :  { %940 = vmatpush3.bf16.msra.mxu1 %v1022_v21 }
  0x1a   :  { %941 = vmatprep.subr.bf16.mxu1 %v1023_v38 }
  0x1b   :  { %910 = vmatpush3.bf16.msra.mxu0 %v1015_v12 }
  0x1c   :  { %911 = vmatprep.subr.bf16.mxu0 %v1016_v14 }
  0x1d   :  { %942 = vmatpush3.bf16.msra.mxu1 %v1023_v38 }
  0x1e   :  { %943 = vmatprep.subr.bf16.mxu1 %v1024_v39 }
  0x1f   :  { %912 = vmatpush3.bf16.msra.mxu0 %v1016_v14 }
  0x20   :  { %961 = vmatprep.subr.bf16.mxu0 %v1025_v40 }
  0x21   :  { %944 = vmatpush3.bf16.msra.mxu1 %v1024_v39 }
  0x22   :  { %914 = vmatmul.mubr.bf16.vlgmr.msra.gmra.mxu0 %v58_v20  ;;  %993 = vmatprep.subr.bf16.mxu1 %v1025_v40 }
  0x23   :  { %917 = vmatprep.mubr.bf16.mxu0 %v59_v22  ;;  %962 = vmatpush3.bf16.msra.mxu0 %v1025_v40 }
  0x24   :  { %963 = vmatprep.subr.bf16.mxu0 %v1026_v41 }
  0x27   :  { %964 = vmatpush3.bf16.msra.mxu0 %v1026_v41 }
  0x28   :  { %965 = vmatprep.subr.bf16.mxu0 %v1027_v42 }
  0x2a   :  { %918 = vmatmul.mubr.bf16.gmra.mxu0 %v60_v27 }
  0x2b   :  { %921 = vmatprep.mubr.bf16.mxu0 %v61_v28  ;;  %966 = vmatpush3.bf16.msra.mxu0 %v1027_v42 }
  0x2c   :  { %967 = vmatprep.subr.bf16.mxu0 %v1028_v43 }
  0x2f   :  { %968 = vmatpush3.bf16.msra.mxu0 %v1028_v43 }
  0x30   :  { %969 = vmatprep.subr.bf16.mxu0 %v1029_v44 }
  0x32   :  { %922 = vmatmul.mubr.bf16.gmra.mxu0 %v62_v33 }
  0x33   :  { %925 = vmatprep.mubr.bf16.mxu0 %v63_v34  ;;  %970 = vmatpush3.bf16.msra.mxu0 %v1029_v44 }
  0x34   :  { %971 = vmatprep.subr.bf16.mxu0 %v1030_v5 }
  0x37   :  { %972 = vmatpush3.bf16.msra.mxu0 %v1030_v5 }
  0x38   :  { %973 = vmatprep.subr.bf16.mxu0 %v1031_v6 }
  0x3a   :  { %926 = vmatmul.mubr.bf16.gmra.mxu0 %v64_v37 }
  0x3b   :  { %974 = vmatpush3.bf16.msra.mxu0 %v1031_v6 }
  0x3c   :  { %975 = vmatprep.subr.bf16.mxu0 %v1032_v7 }
  0x3f   :  { %976 = vmatpush3.bf16.msra.mxu0 %v1032_v7 }
  0xe2   :  { %v915_v45 = vpop.f32.mrf.mxu0 }
  0xe4   :  { %v184_v46 = vpop.f32.mrf.mxu0 }
  0xe6   :  { %v916_v47 = vpop.f32.mrf.mxu0 }
  0xe7   :  { %v299_v50 = vpack.c.bf16 %v916_v47, %v915_v45 }
  0xe8   :  { %v187_v48 = vpop.f32.mrf.mxu0 }
  0xe9   :  { %v298_v49 = vpack.c.bf16 %v187_v48, %v184_v46 }
  0xea   :  { %v919_v51 = vpop.f32.mrf.mxu0 }
  0xeb   :  { %945 = vmatprep.mubr.bf16.mxu1 %v298_v49  ;;  %v761_v49 = vld [vmem:[%s1214_s4] ss:$0 sm:$0xff] }
  0xec   :  { %v200_v52 = vpop.f32.mrf.mxu0  ;;  %946 = vmatmul.mubr.bf16.vlgmr.msra.gmra.mxu1 %v299_v50 }
  0xed   :  { %1001 = vmatpush3.bf16.msra.mxu1 %v1025_v40 }
  0xee   :  { %v920_v53 = vpop.f32.mrf.mxu0  ;;  %994 = vmatprep.subr.bf16.mxu1 %v1026_v41 }
  0xef   :  { %v301_v56 = vpack.c.bf16 %v920_v53, %v919_v51 }
  0xf0   :  { %v203_v54 = vpop.f32.mrf.mxu0 }
  0xf1   :  { %v300_v55 = vpack.c.bf16 %v203_v54, %v200_v52  ;;  %1002 = vmatpush3.bf16.msra.mxu1 %v1026_v41 }
  0xf2   :  { %v923_v57 = vpop.f32.mrf.mxu0  ;;  %995 = vmatprep.subr.bf16.mxu1 %v1027_v42 }
  0xf3   :  { %949 = vmatprep.mubr.bf16.mxu1 %v300_v55 }
  0xf4   :  { %v216_v58 = vpop.f32.mrf.mxu0  ;;  %950 = vmatmul.mubr.bf16.gmra.mxu1 %v301_v56 }
  0xf5   :  { %1003 = vmatpush3.bf16.msra.mxu1 %v1027_v42 }
  0xf6   :  { %v924_v59 = vpop.f32.mrf.mxu0  ;;  %996 = vmatprep.subr.bf16.mxu1 %v1028_v43 }
  0xf7   :  { %v303_v62 = vpack.c.bf16 %v924_v59, %v923_v57 }
  0xf8   :  { %v219_v60 = vpop.f32.mrf.mxu0 }
  0xf9   :  { %v302_v61 = vpack.c.bf16 %v219_v60, %v216_v58  ;;  %1004 = vmatpush3.bf16.msra.mxu1 %v1028_v43 }
  0xfa   :  { %v927_v63 = vpop.f32.mrf.mxu0  ;;  %997 = vmatprep.subr.bf16.mxu1 %v1029_v44 }
  0xfb   :  { %953 = vmatprep.mubr.bf16.mxu1 %v302_v61 }
  0xfc   :  { %v232_v0 = vpop.f32.mrf.mxu0  ;;  %954 = vmatmul.mubr.bf16.gmra.mxu1 %v303_v62 }
  0xfd   :  { %1005 = vmatpush3.bf16.msra.mxu1 %v1029_v44 }
  0xfe   :  { %v928_v1 = vpop.f32.mrf.mxu0  ;;  %998 = vmatprep.subr.bf16.mxu1 %v1030_v5 }
  0xff   :  { %v305_v4 = vpack.c.bf16 %v928_v1, %v927_v63 }
 0x100   :  { %v235_v2 = vpop.f32.mrf.mxu0 }
 0x101   :  { %v304_v3 = vpack.c.bf16 %v235_v2, %v232_v0  ;;  %1006 = vmatpush3.bf16.msra.mxu1 %v1030_v5 }
 0x102   :  { %999 = vmatprep.subr.bf16.mxu1 %v1031_v6 }
 0x103   :  { %957 = vmatprep.mubr.bf16.mxu1 %v304_v3 }
 0x104   :  { %958 = vmatmul.mubr.bf16.gmra.mxu1 %v305_v4 }
 0x105   :  { %1007 = vmatpush3.bf16.msra.mxu1 %v1031_v6 }
 0x106   :  { %1000 = vmatprep.subr.bf16.mxu1 %v1032_v7 }
 0x109   :  { %1008 = vmatpush3.bf16.msra.mxu1 %v1032_v7 }
 0x1ac   :  { %v947_v8 = vpop.f32.mrf.mxu1 }
 0x1ad   :  { %v469_v15 = vmax.f32 %v947_v8, 0.0 }
 0x1ae   :  { %v404_v9 = vpop.f32.mrf.mxu1 }
 0x1af   :  { %v467_v13 = vmax.f32 %v404_v9, 0.0 }
 0x1b0   :  { %v948_v10 = vpop.f32.mrf.mxu1 }
 0x1b1   :  { %v470_v11 = vmax.f32 %v948_v10, 0.0 }
 0x1b2   :  { %v407_v12 = vpop.f32.mrf.mxu1 }
 0x1b3   :  { %v468_v14 = vmax.f32 %v407_v12, 0.0  ;;  %v484_v18 = vpack.c.bf16 %v470_v11, %v469_v15 }
 0x1b4   :  { %v951_v16 = vpop.f32.mrf.mxu1 }
 0x1b5   :  { %v483_v17 = vpack.c.bf16 %v468_v14, %v467_v13  ;;  %v473_v25 = vmax.f32 %v951_v16, 0.0 }
 0x1b6   :  { %v420_v19 = vpop.f32.mrf.mxu1 }
 0x1b7   :  { %977 = vmatprep.mubr.bf16.mxu0 %v483_v17  ;;  %v471_v23 = vmax.f32 %v420_v19, 0.0 }
 0x1b8   :  { %v952_v20 = vpop.f32.mrf.mxu1  ;;  %978 = vmatmul.mubr.bf16.vlgmr.msra.gmra.mxu0 %v484_v18 }
 0x1b9   :  { %v474_v21 = vmax.f32 %v952_v20, 0.0 }
 0x1ba   :  { %v423_v22 = vpop.f32.mrf.mxu1 }
 0x1bb   :  { %v472_v24 = vmax.f32 %v423_v22, 0.0  ;;  %v486_v28 = vpack.c.bf16 %v474_v21, %v473_v25 }
 0x1bc   :  { %v955_v26 = vpop.f32.mrf.mxu1 }
 0x1bd   :  { %v485_v27 = vpack.c.bf16 %v472_v24, %v471_v23  ;;  %v477_v35 = vmax.f32 %v955_v26, 0.0 }
 0x1be   :  { %v436_v29 = vpop.f32.mrf.mxu1 }
 0x1bf   :  { %981 = vmatprep.mubr.bf16.mxu0 %v485_v27  ;;  %v475_v33 = vmax.f32 %v436_v29, 0.0 }
 0x1c0   :  { %v956_v30 = vpop.f32.mrf.mxu1  ;;  %982 = vmatmul.mubr.bf16.gmra.mxu0 %v486_v28 }
 0x1c1   :  { %v478_v31 = vmax.f32 %v956_v30, 0.0 }
 0x1c2   :  { %v439_v32 = vpop.f32.mrf.mxu1 }
 0x1c3   :  { %v476_v34 = vmax.f32 %v439_v32, 0.0  ;;  %v488_v38 = vpack.c.bf16 %v478_v31, %v477_v35 }
 0x1c4   :  { %v959_v36 = vpop.f32.mrf.mxu1 }
 0x1c5   :  { %v487_v37 = vpack.c.bf16 %v476_v34, %v475_v33  ;;  %v481_v45 = vmax.f32 %v959_v36, 0.0 }
 0x1c6   :  { %v452_v39 = vpop.f32.mrf.mxu1 }
 0x1c7   :  { %985 = vmatprep.mubr.bf16.mxu1 %v487_v37  ;;  %v479_v43 = vmax.f32 %v452_v39, 0.0 }
 0x1c8   :  { %v960_v40 = vpop.f32.mrf.mxu1  ;;  %986 = vmatmul.mubr.bf16.vlgmr.msra.gmra.mxu1 %v488_v38 }
 0x1c9   :  { %v482_v41 = vmax.f32 %v960_v40, 0.0 }
 0x1ca   :  { %v455_v42 = vpop.f32.mrf.mxu1 }
 0x1cb   :  { %v480_v44 = vmax.f32 %v455_v42, 0.0  ;;  %v490_v47 = vpack.c.bf16 %v482_v41, %v481_v45 }
 0x1cd   :  { %v489_v46 = vpack.c.bf16 %v480_v44, %v479_v43 }
 0x1cf   :  { %989 = vmatprep.mubr.bf16.mxu1 %v489_v46 }
 0x1d0   :  { %990 = vmatmul.mubr.bf16.gmra.mxu1 %v490_v47 }
 0x278   :  { %v979_v48 = vpop.f32.mrf.mxu0 }
 0x279   :  { %v605_v52 = vadd.f32 %v979_v48, %v761_v49 }
 0x27a   :  { %v596_v50 = vpop.f32.mrf.mxu0 }
 0x27b   :  { %v597_v55 = vadd.f32 %v761_v49, %v596_v50 }
 0x27c   :  { %v980_v51 = vpop.f32.mrf.mxu0 }
 0x27d   :  { %v608_v53 = vadd.f32 %v980_v51, %v761_v49 }
 0x27e   :  { %v599_v54 = vpop.f32.mrf.mxu0 }
 0x27f   :  { %v810_v56 = vpack.c.bf16 %v608_v53, %v605_v52  ;;  %v600_v57 = vadd.f32 %v761_v49, %v599_v54 }
 0x280   :  { %v983_v58 = vpop.f32.mrf.mxu0 }
 0x281   :  { %842 = vst [vmem:[%s1215_s5 + $0x8] sm:$0xff] %v810_v56   ;;  %v805_v59 = vpack.c.bf16 %v600_v57, %v597_v55  ;;  %v621_v62 = vadd.f32 %v983_v58, %v761_v49 }
 0x282   :  { %v612_v60 = vpop.f32.mrf.mxu0 }
 0x283   :  { %806 = vst [vmem:[%s1215_s5] sm:$0xff] %v805_v59   ;;  %v613_v1 = vadd.f32 %v761_v49, %v612_v60 }
 0x284   :  { %v984_v61 = vpop.f32.mrf.mxu0 }
 0x285   :  { %v624_v63 = vadd.f32 %v984_v61, %v761_v49 }
 0x286   :  { %v615_v0 = vpop.f32.mrf.mxu0 }
 0x287   :  { %v820_v2 = vpack.c.bf16 %v624_v63, %v621_v62  ;;  %v616_v3 = vadd.f32 %v761_v49, %v615_v0 }
 0x288   :  { %v987_v4 = vpop.f32.mrf.mxu1 }
 0x289   :  { %844 = vst [vmem:[%s1215_s5 + $0x18] sm:$0xff] %v820_v2   ;;  %v815_v5 = vpack.c.bf16 %v616_v3, %v613_v1  ;;  %v637_v8 = vadd.f32 %v987_v4, %v761_v49 }
 0x28a   :  { %v628_v6 = vpop.f32.mrf.mxu1 }
 0x28b   :  { %843 = vst [vmem:[%s1215_s5 + $0x10] sm:$0xff] %v815_v5   ;;  %v629_v11 = vadd.f32 %v761_v49, %v628_v6 }
 0x28c   :  { %v988_v7 = vpop.f32.mrf.mxu1 }
 0x28d   :  { %v640_v9 = vadd.f32 %v988_v7, %v761_v49 }
 0x28e   :  { %v631_v10 = vpop.f32.mrf.mxu1 }
 0x28f   :  { %v830_v12 = vpack.c.bf16 %v640_v9, %v637_v8  ;;  %v632_v13 = vadd.f32 %v761_v49, %v631_v10 }
 0x290   :  { %v991_v14 = vpop.f32.mrf.mxu1 }
 0x291   :  { %846 = vst [vmem:[%s1215_s5 + $0x28] sm:$0xff] %v830_v12   ;;  %v825_v15 = vpack.c.bf16 %v632_v13, %v629_v11  ;;  %v653_v18 = vadd.f32 %v991_v14, %v761_v49 }
 0x292   :  { %v644_v16 = vpop.f32.mrf.mxu1 }
 0x293   :  { %845 = vst [vmem:[%s1215_s5 + $0x20] sm:$0xff] %v825_v15   ;;  %v645_v21 = vadd.f32 %v761_v49, %v644_v16 }
 0x294   :  { %v992_v17 = vpop.f32.mrf.mxu1 }
 0x295   :  { %v656_v19 = vadd.f32 %v992_v17, %v761_v49 }
 0x296   :  { %v647_v20 = vpop.f32.mrf.mxu1 }
 0x297   :  { %v840_v22 = vpack.c.bf16 %v656_v19, %v653_v18  ;;  %v648_v23 = vadd.f32 %v761_v49, %v647_v20 }
 0x299   :  { %848 = vst [vmem:[%s1215_s5 + $0x38] sm:$0xff] %v840_v22   ;;  %v835_v24 = vpack.c.bf16 %v648_v23, %v645_v21 }
 0x29b   :  { %847 = vst [vmem:[%s1215_s5 + $0x30] sm:$0xff] %v835_v24  }

</bundles_post_ra>
